<compile_context>
chip_gen: v6e
topology: v6e:2x2x1
jax: 0.10.0
libtpu: 0.0.40
codegen_flags: <defaults>
</compile_context>

<pallas_src>
import functools
import math

import jax
import jax.numpy as jnp
from jax.experimental import pallas as pl
from jax.experimental.pallas import tpu as pltpu


def _round_up(x, m):
    return ((x + m - 1) // m) * m


def _round_down(x, m):
    return (x // m) * m


def _num_tensorcores():
    """Best-effort TensorCores-per-device count (v7x has 2, v5e/v6e have 1)."""
    try:
        kind = jax.devices()[0].device_kind.lower()
    except Exception:
        return 1
    return 2 if ("v7" in kind or "7x" in kind) else 1


def _neg_iou_kernel(p_ref, t_ref, inter_ref, sums_ref, acc_i, acc_s, *,
                    k_steps, block_f, row_len, need_mask, split_features, fold):
    p = pl.program_id(0)      # core / work-chunk axis
    k = pl.program_id(2)      # reduction step over feature blocks

    @pl.when(k == 0)
    def _():
        acc_i[...] = jnp.zeros_like(acc_i)
        acc_s[...] = jnp.zeros_like(acc_s)

    pb = p_ref[...].astype(jnp.float32)
    tb = t_ref[...].astype(jnp.float32)
    prod = pb * tb
    ssum = pb + tb

    def _accum(pr, ss):
        # Optional fold to half-width accumulators: one extra VPU add per
        # output vreg, half the accumulator load/store traffic and VMEM.
        if fold == 2:
            h = block_f // 2
            pr = pr[:, :h] + pr[:, h:]
            ss = ss[:, :h] + ss[:, h:]
        acc_i[...] += pr
        acc_s[...] += ss

    if need_mask:
        # Only the tail feature block (and phantom blocks from the multi-core
        # feature split, whose block index was clamped in the index_map) need
        # masking; steady-state blocks take the unmasked fast path.
        feat_blk = p * k_steps + k if split_features else k
        base = feat_blk * block_f
        is_edge = base + block_f > row_len

        @pl.when(jnp.logical_not(is_edge))
        def _():
            _accum(prod, ssum)

        @pl.when(is_edge)
        def _():
            col = jax.lax.broadcasted_iota(jnp.int32, prod.shape, dimension=1)
            valid = (base + col) < row_len
            _accum(jnp.where(valid, prod, 0.0), jnp.where(valid, ssum, 0.0))
    else:
        _accum(prod, ssum)

    @pl.when(k == k_steps - 1)
    def _():
        inter_ref[0, :, :] = jnp.sum(acc_i[...], axis=1, keepdims=True)
        sums_ref[0, :, :] = jnp.sum(acc_s[...], axis=1, keepdims=True)


def neg_iou_loss(predict, target, *, average=False, block_f=None):
    """loss = 1 - mean_b( sum(p*t) / (sum(p+t-p*t) + 1e-6) ).  Returns f32.

    `average` is kept only for interface parity with the PyTorch module; the
    reference forward() never uses it.
    """
    del average
    assert predict.shape == target.shape, (predict.shape, target.shape)
    b = predict.shape[0]
    f = int(math.prod(predict.shape[1:])) if predict.ndim > 1 else 1
    itemsize = jnp.dtype(predict.dtype).itemsize
    cores = _num_tensorcores()

    # --- re-pack (b, f) -> (rows, row_len) so the sublane dim is dense -------
    sub = max(8, 32 // max(1, itemsize))
    g = 1
    if b < sub:
        cand = sub // math.gcd(b, sub)          # smallest g with (b*g) % sub == 0
        if 0 < cand <= f and f % cand == 0:
            g = cand
    rows = b * g
    row_len = f // g
    pf = predict.reshape(rows, row_len)         # contiguous reshape, no copy
    tf = target.reshape(rows, row_len)

    # --- dtype-aware tile sizing (target input-bytes per block per step) -----
    target_block_bytes = (4 << 20) if cores > 1 else (2 << 20)
    target_elems = max(8 * 128, target_block_bytes // itemsize)

    if block_f is not None:
        block_f = max(128, (int(block_f) // 128) * 128)
        block_r = rows
    elif rows * 128 > target_elems:
        # Large batch: tile rows too, so buffers stay bounded even at the
        # minimum 128-lane feature tile (v7x's 64 MiB physical VMEM is the
        # tightest ceiling).
        block_r = max(8, _round_down(target_elems // 128, 8))
        block_f = 128
    else:
        block_r = rows
        bf = _round_down(max(128, target_elems // max(rows, 1)), 128)
        block_f = max(128, min(bf, _round_up(row_len, 128)))

    n_rb = -(-rows // block_r)                  # row blocks
    nb = -(-row_len // block_f)                 # feature blocks

    # --- multi-TensorCore work split (v7x only; v5e/v6e keep n_par = 1) ------
    split_features = split_rows = False
    n_par = 1
    if cores > 1:
        if nb >= 2:
            n_par, split_features = cores, True
        elif n_rb >= 2:
            n_par, split_rows = cores, True
    k_steps = -(-nb // n_par) if split_features else nb
    rb_per_p = -(-n_rb // n_par) if split_rows else n_rb
    n_par_out = n_par if split_features else 1
    need_mask = (nb * block_f != row_len) or (split_features and k_steps * n_par != nb)

    # --- folded accumulators ---------------------------------------------------
    fold = 2 if block_f % 256 == 0 else 1
    acc_f = block_f // fold

    def in_map(p, r, k):
        fk = jnp.minimum(p * k_steps + k, nb - 1) if split_features else k
        rr = jnp.minimum(p * rb_per_p + r, n_rb - 1) if split_rows else r
        return (rr, fk)

    def out_map(p, r, k):
        rr = jnp.minimum(p * rb_per_p + r, n_rb - 1) if split_rows else r
        return (p if split_features else 0, rr, 0)

    kernel = functools.partial(
        _neg_iou_kernel, k_steps=k_steps, block_f=block_f, row_len=row_len,
        need_mask=need_mask, split_features=split_features, fold=fold)

    # --- VMEM budget / compiler params -----------------------------------------
    in_block_bytes = block_r * block_f * itemsize
    buf_bytes = (2 * 2 * in_block_bytes            # 2 inputs, double-buffered
                 + 2 * block_r * acc_f * 4         # f32 accumulators
                 + 2 * 2 * block_r * 4)            # tiny output blocks
    vmem_limit = int(min(60 << 20, max(32 << 20, buf_bytes + (8 << 20))))

    if n_par > 1:
        # Only CORE_PARALLEL reliably shards a grid axis across both v7x TCs.
        sem = (pltpu.CORE_PARALLEL, pltpu.PARALLEL, pltpu.ARBITRARY)
    else:
        sem = (pltpu.PARALLEL, pltpu.PARALLEL, pltpu.ARBITRARY)

    total = rows * row_len
    cost = pl.CostEstimate(
        flops=6 * total,
        transcendentals=0,
        bytes_accessed=2 * total * itemsize + 2 * n_par_out * rows * 4)

    out_i, out_s = pl.pallas_call(
        kernel,
        out_shape=(jax.ShapeDtypeStruct((n_par_out, rows, 1), jnp.float32),
                   jax.ShapeDtypeStruct((n_par_out, rows, 1), jnp.float32)),
        grid_spec=pltpu.PrefetchScalarGridSpec(
            num_scalar_prefetch=0,
            grid=(n_par, rb_per_p, k_steps),
            in_specs=[pl.BlockSpec((block_r, block_f), in_map),
                      pl.BlockSpec((block_r, block_f), in_map)],
            out_specs=(pl.BlockSpec((1, block_r, 1), out_map),
                       pl.BlockSpec((1, block_r, 1), out_map)),
            scratch_shapes=[pltpu.VMEM((block_r, acc_f), jnp.float32),
                            pltpu.VMEM((block_r, acc_f), jnp.float32)]),
        compiler_params=pltpu.CompilerParams(
            dimension_semantics=sem, vmem_limit_bytes=vmem_limit),
        cost_estimate=cost,
    )(pf, tf)

    # Tiny epilogue in plain JAX: regroup packed rows back into batches.
    inter = jnp.sum(out_i, axis=(0, 2)).reshape(b, g).sum(axis=1)   # (b,)
    sums = jnp.sum(out_s, axis=(0, 2)).reshape(b, g).sum(axis=1)    # (b,)
    union = sums - inter + 1e-6
    return 1.0 - jnp.sum(inter / union) / b                          # f32 scalar


if __name__ == "__main__":
    def ref_loss(p, t):
        dims = tuple(range(1, p.ndim))
        p32 = p.astype(jnp.float32)
        t32 = t.astype(jnp.float32)
        inter = jnp.sum(p32 * t32, axis=dims)
        union = jnp.sum(p32 + t32 - p32 * t32, axis=dims) + 1e-6
        return 1.0 - jnp.sum(inter / union) / p.shape[0]

    key = jax.random.PRNGKey(0)
    k1, k2, k3, k4 = jax.random.split(key, 4)

    # Typical NCHW segmentation-style input.
    p1 = jax.random.uniform(k1, (2, 4, 16, 16), dtype=jnp.float32)
    t1 = jax.random.uniform(k2, (2, 4, 16, 16), dtype=jnp.float32)
    # Awkward shape: non-divisible feature count -> exercises in-kernel masking.
    p2 = jax.random.uniform(k3, (3, 5, 7, 9), dtype=jnp.float32)
    t2 = jax.random.uniform(k4, (3, 5, 7, 9), dtype=jnp.float32)

    cases = [
        (p1, t1, None),                                            # folded acc, single tile
        (p1, t1, 128),                                             # multi-block reduction
        (p1.astype(jnp.bfloat16), t1.astype(jnp.bfloat16), None),  # narrow-dtype sizing path
        (p2, t2, None),                                            # masked tail tile
        (p2, t2, 128),                                             # multi-block + masked tail
        (p2, t2, 256),                                             # folded acc + masked tail
    ]
    for p, t, bf in cases:
        got = neg_iou_loss(p, t, block_f=bf)
        jax.block_until_ready(got)
        want = ref_loss(p, t)
        assert jnp.allclose(got, want, rtol=1e-5, atol=1e-5), (p.shape, p.dtype, bf, got, want)

    print("KERNEL_OK")
</pallas_src>

<mosaic_0001>
module attributes {stable_mosaic.version = 11 : i64} {
  func.func @_neg_iou_kernel(%arg0: i32, %arg1: i32, %arg2: i32, %arg3: memref<8x256xf32, #tpu.memory_space<vmem>>, %arg4: memref<8x256xf32, #tpu.memory_space<vmem>>, %arg5: memref<1x8x1xf32, #tpu.memory_space<vmem>>, %arg6: memref<1x8x1xf32, #tpu.memory_space<vmem>>, %arg7: memref<8x128xf32, #tpu.memory_space<vmem>>, %arg8: memref<8x128xf32, #tpu.memory_space<vmem>>) attributes {dimension_semantics = [#tpu.dimension_semantics<parallel>, #tpu.dimension_semantics<parallel>, #tpu.dimension_semantics<arbitrary>], iteration_bounds = array<i64: 1, 1, 1>, scalar_prefetch = 0 : i64, scratch_operands = 2 : i64, tpu.core_type = #tpu.core_type<tc>, window_params = [{transform_indices = @transform_0, window_bounds = array<i64: 8, 256>}, {transform_indices = @transform_1, window_bounds = array<i64: 8, 256>}, {transform_indices = @transform_2, window_bounds = array<i64: 1, 8, 1>}, {transform_indices = @transform_3, window_bounds = array<i64: 1, 8, 1>}]} {
    %c0_i32 = arith.constant 0 : i32
    %0 = arith.cmpi eq, %arg2, %c0_i32 : i32
    %1 = arith.extui %0 : i1 to i32
    %c0_i32_0 = arith.constant 0 : i32
    %2 = arith.cmpi ne, %1, %c0_i32_0 : i32
    scf.if %2 {
      %cst = arith.constant 0.000000e+00 : f32
      %22 = vector.broadcast %cst : f32 to vector<8x128xf32>
      %c0_14 = arith.constant 0 : index
      %c0_15 = arith.constant 0 : index
      %23 = vector.load %arg7[%c0_14, %c0_15] : memref<8x128xf32, #tpu.memory_space<vmem>>, vector<8x128xf32>
      tpu.vector_store %arg7[%c0_14, %c0_15], %22 {strides = array<i32>} : memref<8x128xf32, #tpu.memory_space<vmem>>, vector<8x128xf32>,
      %cst_16 = arith.constant 0.000000e+00 : f32
      %24 = vector.broadcast %cst_16 : f32 to vector<8x128xf32>
      %c0_17 = arith.constant 0 : index
      %c0_18 = arith.constant 0 : index
      %25 = vector.load %arg8[%c0_17, %c0_18] : memref<8x128xf32, #tpu.memory_space<vmem>>, vector<8x128xf32>
      tpu.vector_store %arg8[%c0_17, %c0_18], %24 {strides = array<i32>} : memref<8x128xf32, #tpu.memory_space<vmem>>, vector<8x128xf32>,
    } else {
    }
    %c0 = arith.constant 0 : index
    %c0_1 = arith.constant 0 : index
    %3 = vector.load %arg3[%c0, %c0_1] : memref<8x256xf32, #tpu.memory_space<vmem>>, vector<8x256xf32>
    %c0_2 = arith.constant 0 : index
    %c0_3 = arith.constant 0 : index
    %4 = vector.load %arg4[%c0_2, %c0_3] : memref<8x256xf32, #tpu.memory_space<vmem>>, vector<8x256xf32>
    %5 = arith.mulf %3, %4 : vector<8x256xf32>
    %6 = arith.addf %3, %4 : vector<8x256xf32>
    %7 = vector.extract_strided_slice %5 {offsets = [0, 0], sizes = [8, 128], strides = [1, 1]} : vector<8x256xf32> to vector<8x128xf32>
    %8 = vector.extract_strided_slice %5 {offsets = [0, 128], sizes = [8, 128], strides = [1, 1]} : vector<8x256xf32> to vector<8x128xf32>
    %9 = arith.addf %7, %8 : vector<8x128xf32>
    %10 = vector.extract_strided_slice %6 {offsets = [0, 0], sizes = [8, 128], strides = [1, 1]} : vector<8x256xf32> to vector<8x128xf32>
    %11 = vector.extract_strided_slice %6 {offsets = [0, 128], sizes = [8, 128], strides = [1, 1]} : vector<8x256xf32> to vector<8x128xf32>
    %12 = arith.addf %10, %11 : vector<8x128xf32>
    %c0_4 = arith.constant 0 : index
    %c0_5 = arith.constant 0 : index
    %13 = vector.load %arg7[%c0_4, %c0_5] : memref<8x128xf32, #tpu.memory_space<vmem>>, vector<8x128xf32>
    %14 = arith.addf %13, %9 : vector<8x128xf32>
    %c0_6 = arith.constant 0 : index
    %c0_7 = arith.constant 0 : index
    %15 = vector.load %arg7[%c0_6, %c0_7] : memref<8x128xf32, #tpu.memory_space<vmem>>, vector<8x128xf32>
    tpu.vector_store %arg7[%c0_6, %c0_7], %14 {strides = array<i32>} : memref<8x128xf32, #tpu.memory_space<vmem>>, vector<8x128xf32>,
    %c0_8 = arith.constant 0 : index
    %c0_9 = arith.constant 0 : index
    %16 = vector.load %arg8[%c0_8, %c0_9] : memref<8x128xf32, #tpu.memory_space<vmem>>, vector<8x128xf32>
    %17 = arith.addf %16, %12 : vector<8x128xf32>
    %c0_10 = arith.constant 0 : index
    %c0_11 = arith.constant 0 : index
    %18 = vector.load %arg8[%c0_10, %c0_11] : memref<8x128xf32, #tpu.memory_space<vmem>>, vector<8x128xf32>
    tpu.vector_store %arg8[%c0_10, %c0_11], %17 {strides = array<i32>} : memref<8x128xf32, #tpu.memory_space<vmem>>, vector<8x128xf32>,
    %c0_i32_12 = arith.constant 0 : i32
    %19 = arith.cmpi eq, %arg2, %c0_i32_12 : i32
    %20 = arith.extui %19 : i1 to i32
    %c0_i32_13 = arith.constant 0 : i32
    %21 = arith.cmpi ne, %20, %c0_i32_13 : i32
    scf.if %21 {
      %c0_14 = arith.constant 0 : index
      %c0_15 = arith.constant 0 : index
      %22 = vector.load %arg7[%c0_14, %c0_15] : memref<8x128xf32, #tpu.memory_space<vmem>>, vector<8x128xf32>
      %cst = arith.constant dense<0.000000e+00> : vector<8xf32>
      %23 = vector.multi_reduction <add>, %22, %cst [1] : vector<8x128xf32> to vector<8xf32>
      %24 = vector.shape_cast %23 : vector<8xf32> to vector<8x1xf32>
      %c0_16 = arith.constant 0 : index
      %c0_17 = arith.constant 0 : index
      %c0_18 = arith.constant 0 : index
      %25 = vector.load %arg5[%c0_16, %c0_17, %c0_18] : memref<1x8x1xf32, #tpu.memory_space<vmem>>, vector<1x8x1xf32>
      %26 = vector.shape_cast %25 : vector<1x8x1xf32> to vector<8x1xf32>
      %27 = vector.shape_cast %24 : vector<8x1xf32> to vector<1x8x1xf32>
      tpu.vector_store %arg5[%c0_16, %c0_17, %c0_18], %27 {strides = array<i32>} : memref<1x8x1xf32, #tpu.memory_space<vmem>>, vector<1x8x1xf32>,
      %c0_19 = arith.constant 0 : index
      %c0_20 = arith.constant 0 : index
      %28 = vector.load %arg8[%c0_19, %c0_20] : memref<8x128xf32, #tpu.memory_space<vmem>>, vector<8x128xf32>
      %cst_21 = arith.constant dense<0.000000e+00> : vector<8xf32>
      %29 = vector.multi_reduction <add>, %28, %cst_21 [1] : vector<8x128xf32> to vector<8xf32>
      %30 = vector.shape_cast %29 : vector<8xf32> to vector<8x1xf32>
      %c0_22 = arith.constant 0 : index
      %c0_23 = arith.constant 0 : index
      %c0_24 = arith.constant 0 : index
      %31 = vector.load %arg6[%c0_22, %c0_23, %c0_24] : memref<1x8x1xf32, #tpu.memory_space<vmem>>, vector<1x8x1xf32>
      %32 = vector.shape_cast %31 : vector<1x8x1xf32> to vector<8x1xf32>
      %33 = vector.shape_cast %30 : vector<8x1xf32> to vector<1x8x1xf32>
      tpu.vector_store %arg6[%c0_22, %c0_23, %c0_24], %33 {strides = array<i32>} : memref<1x8x1xf32, #tpu.memory_space<vmem>>, vector<1x8x1xf32>,
    } else {
    }
    return
  }
  func.func @transform_0(%arg0: i32, %arg1: i32, %arg2: i32) -> (i32, i32) {
    %c0_i32 = arith.constant 0 : i32
    return %arg1, %arg2 : i32, i32
  }
  func.func @transform_1(%arg0: i32, %arg1: i32, %arg2: i32) -> (i32, i32) {
    %c0_i32 = arith.constant 0 : i32
    return %arg1, %arg2 : i32, i32
  }
  func.func @transform_2(%arg0: i32, %arg1: i32, %arg2: i32) -> (i32, i32, i32) {
    %c0_i32 = arith.constant 0 : i32
    %c0_i32_0 = arith.constant 0 : i32
    %c0_i32_1 = arith.constant 0 : i32
    return %c0_i32, %arg1, %c0_i32_0 : i32, i32, i32
  }
  func.func @transform_3(%arg0: i32, %arg1: i32, %arg2: i32) -> (i32, i32, i32) {
    %c0_i32 = arith.constant 0 : i32
    %c0_i32_0 = arith.constant 0 : i32
    %c0_i32_1 = arith.constant 0 : i32
    return %c0_i32, %arg1, %c0_i32_0 : i32, i32, i32
  }
}

</mosaic_0001>

<bundles_post_ra>
// kernel: tpu_custom_call.1
= control target key start
LH: loop header
LB: loop body
LE: loop exit
PB: predicated region body
PF: predicated region fallthrough
CT: control target
= control target key end

     0   :  { %9 = vsyncpa [#allocation5], 0  ;;  %s161_s0 = inlined_call_operand.hbm [shape: f32[8,256], index: 0, kind: input, shape index: {}]   ;;  %s162_s1 = inlined_call_operand.hbm [shape: f32[8,256], index: 1, kind: input, shape index: {}]   ;;  %s163_s2 = inlined_call_operand.vmem [shape: f32[1,8,1], index: 2, kind: output, shape index: {0}]   ;;  %s164_s3 = inlined_call_operand.vmem [shape: f32[1,8,1], index: 3, kind: output, shape index: {1}]  }
   0x1   :  { %10 = vsyncpa [#allocation7], 0  ;;  %s127_s12 = smov [#allocation4]   ;;  %s128_s14 = smov [#allocation6]  }
   0x2   :  { %s17_s13 = sshll.u32 %s127_s12, 4  ;;  %s27_s15 = sshll.u32 %s128_s14, 4  ;;  %s18_s13 = int_to_ptr.vmem [resolvable:$true] %s17_s13  ;;  %s28_s15 = int_to_ptr.vmem [resolvable:$true] %s27_s15 }
   0x3   :  { %s91_s16 = scalar_lea.vmem %s18_s13, 256  ;;  %p96_p1 = scmp.lt.s32.totalorder %s18_s13, %s18_s13 }
   0x4   :  { %p92_p0 = scmp.ne.s32.totalorder %s18_s13, %s91_s16  ;;  %p97_p2 = scmp.lt.s32.totalorder %s91_s16, %s91_s16 }
   0x6   :  { %p98_p3 = por %p97_p2, %p96_p1 }
   0x8   :  { %p99_p4 = pnand %p98_p3, %p92_p0 }
   0xa   :  { %102 = shalt.err (!%p99_p4)
}
   0xb   :  { %20 = dma.hbm_to_vmem [thread:$0]  %s161_s0, 256, %s18_s13, [#allocation5]  }
   0xc   :  { %s111_s19 = scalar_lea.vmem %s28_s15, 256  ;;  %p116_p6 = scmp.lt.s32.totalorder %s28_s15, %s28_s15 }
   0xd   :  { %p112_p5 = scmp.ne.s32.totalorder %s28_s15, %s111_s19  ;;  %p117_p7 = scmp.lt.s32.totalorder %s111_s19, %s111_s19 }
   0xf   :  { %p118_p8 = por %p117_p7, %p116_p6 }
  0x11   :  { %p119_p9 = pnand %p118_p8, %p112_p5 }
  0x13   :  { %122 = shalt.err (!%p119_p9)
}
  0x14   :  { %30 = dma.hbm_to_vmem [thread:$0]  %s162_s1, 256, %s28_s15, [#allocation7]  }
  0x15   :  { %123 = dma.done.wait [#allocation5], 256  }
  0x16   :  { %124 = vsyncadd [#allocation5], 4294967040 }
  0x17   :  { %125 = dma.done.wait [#allocation7], 256  }
  0x18   :  { %126 = vsyncadd [#allocation7], 4294967040  ;;  %v43_v0 = vld [vmem:[#allocation4] sm:$0xff]  ;;  %v44_v1 = vld [vmem:[#allocation4 + $0x8] sm:$0xff]  ;;  %vm65_vm0 = vcmask 7168  }
  0x19   :  { %v45_v2 = vld [vmem:[#allocation6] sm:$0xff]  ;;  %v46_v3 = vld [vmem:[#allocation6 + $0x8] sm:$0xff] }
  0x1a   :  { %v47_v4 = vmul.f32 %v45_v2, %v43_v0  ;;  %v48_v5 = vmul.f32 %v46_v3, %v44_v1  ;;  %v49_v6 = vadd.f32 %v45_v2, %v43_v0  ;;  %v50_v7 = vadd.f32 %v46_v3, %v44_v1 }
  0x1c   :  { %v51_v8 = vadd.f32 %v48_v5, %v47_v4  ;;  %v52_v9 = vadd.f32 %v50_v7, %v49_v6 }
  0x1e   :  { %63 = vadd.xlane.f32.xlu0 %v51_v8 }
  0x22   :  { %68 = vadd.xlane.f32.xlu0 %v52_v9 }
  0xa7   :  { %v64_v10 = vpop.xlane.xlu0 %63 }
  0xa8   :  { %66 = vst.msk [vmem:[%s163_s2] sm:$0xff] %vm65_vm0, %v64_v10 }
  0xab   :  { %v69_v11 = vpop.xlane.xlu0 %68 }
  0xac   :  { %70 = vst.msk [vmem:[%s164_s3] sm:$0xff] %vm65_vm0, %v69_v11 }
  0xad   :  { %79 = vsyncpa [#allocation5], 1 }
  0xae   :  { %80 = vsyncpa [#allocation7], 1 }

</bundles_post_ra>
